<compile_context>
chip_gen: v7x
topology: tpu7x:2x2x1
jax: 0.10.0
libtpu: 0.0.40
codegen_flags: <defaults>
</compile_context>

<pallas_src>
import functools

import jax
import jax.numpy as jnp
from jax import lax
from jax.experimental import pallas as pl
from jax.experimental.pallas import tpu as pltpu

LANE = 128                       # vreg lane width
SUBLANES = 8                     # vreg sublane count
GROUP = SUBLANES * LANE          # 1024 elements = one (8, 128) group
MAX_BLOCK_GROUPS = 256           # groups per tile: 256*1024*4B = 1 MiB f32 / input / buffer
NUM_CORE_SPLITS = 2              # leading "parallel" axis (2 TCs on v7x; serial elsewhere)
MIN_KERNEL_ELEMS = 64 * 1024     # below this a fused XLA reduction is strictly faster


def _mse_partial_kernel(x_ref, t_ref, o_ref, acc_ref, *,
                        num_groups, block_groups, tiles_per_core):
    """Per-core partial sum of (x - t)^2 accumulated in an (8,128) VMEM slab."""
    c = pl.program_id(0)   # core-split axis ("parallel")
    i = pl.program_id(1)   # reduction axis  ("arbitrary")

    @pl.when(i == 0)
    def _():
        acc_ref[...] = jnp.zeros_like(acc_ref)

    # Global tile index *before* clamping; tiles past the end (clamped by the
    # index_map onto the last real tile) must contribute zero -> group mask.
    g = c * tiles_per_core + i
    valid_groups = num_groups - g * block_groups          # may be <= 0 or > block_groups
    gid = lax.broadcasted_iota(jnp.int32, (block_groups, SUBLANES, LANE), 0)

    d = x_ref[...].astype(jnp.float32) - t_ref[...].astype(jnp.float32)
    dd = jnp.where(gid < valid_groups, d * d, 0.0)
    # Leading-axis reduction = pure elementwise vreg adds on the VPU.
    acc_ref[...] = acc_ref[...] + jnp.sum(dd, axis=0)

    @pl.when(i == tiles_per_core - 1)
    def _():
        o_ref[...] = acc_ref[...]


def im_loss_pallas(x, soft_target, *, loss_weight=1.0, reduction="mean",
                   weight=None, avg_factor=None, reduction_override=None,
                   min_kernel_elems=MIN_KERNEL_ELEMS,
                   max_block_groups=MAX_BLOCK_GROUPS):
    assert reduction_override in (None, "none", "mean", "sum")
    # TODO(synk): elementwise `weight` / `avg_factor` paths are no-ops here
    # because the inner mse_loss already returns a scalar (matches the PyTorch
    # module's behavior with weight=None).
    del weight, avg_factor, reduction, reduction_override

    assert x.shape == soft_target.shape
    n = int(x.size)
    lw = float(loss_weight)

    # Tiny inputs: a fused XLA reduction beats kernel launch + pipeline cost.
    if n < max(int(min_kernel_elems), 1):
        d = x.astype(jnp.float32) - soft_target.astype(jnp.float32)
        return jnp.float32(lw) * jnp.mean(d * d)

    xf = x.reshape(-1)
    tf = soft_target.reshape(-1)

    # Only pad (with zeros, so padded diffs are 0) up to the next multiple of
    # one (8,128) group; the common case (n % 1024 == 0) is a free bitcast view.
    pad = (-n) % GROUP
    if pad:
        xf = jnp.pad(xf, (0, pad))
        tf = jnp.pad(tf, (0, pad))

    num_groups = (n + pad) // GROUP
    x3 = xf.reshape(num_groups, SUBLANES, LANE)
    t3 = tf.reshape(num_groups, SUBLANES, LANE)

    block_groups = max(1, min(int(max_block_groups), num_groups))
    num_tiles = pl.cdiv(num_groups, block_groups)
    tiles_per_core = pl.cdiv(num_tiles, NUM_CORE_SPLITS)

    def in_map(c, i):
        # Clamp onto the last real tile; the in-kernel mask zeroes duplicates.
        gt = jnp.minimum(c * tiles_per_core + i, num_tiles - 1)
        return (gt, 0, 0)

    in_bytes = n * (jnp.dtype(x.dtype).itemsize + jnp.dtype(soft_target.dtype).itemsize)
    out_bytes = NUM_CORE_SPLITS * SUBLANES * LANE * 4

    partials = pl.pallas_call(
        functools.partial(_mse_partial_kernel,
                          num_groups=num_groups,
                          block_groups=block_groups,
                          tiles_per_core=tiles_per_core),
        out_shape=jax.ShapeDtypeStruct((NUM_CORE_SPLITS * SUBLANES, LANE), jnp.float32),
        grid_spec=pltpu.PrefetchScalarGridSpec(
            num_scalar_prefetch=0,
            grid=(NUM_CORE_SPLITS, tiles_per_core),
            in_specs=[
                pl.BlockSpec((block_groups, SUBLANES, LANE), in_map),
                pl.BlockSpec((block_groups, SUBLANES, LANE), in_map),
            ],
            out_specs=pl.BlockSpec((SUBLANES, LANE), lambda c, i: (c, 0)),
            scratch_shapes=[pltpu.VMEM((SUBLANES, LANE), jnp.float32)],
        ),
        compiler_params=pltpu.CompilerParams(
            dimension_semantics=("parallel", "arbitrary")),
        cost_estimate=pl.CostEstimate(
            flops=3 * n, transcendentals=0,
            bytes_accessed=in_bytes + out_bytes),
    )(x3, t3)

    # Single cross-lane reduction + scaling once, outside the hot loop.
    return jnp.sum(partials) * jnp.float32(lw / n)


class IMLossPallas:
    """JAX/Pallas port of mmrotate IMLoss."""

    def __init__(self, reduction="mean", loss_weight=1.0):
        self.reduction = reduction
        self.loss_weight = loss_weight

    def __call__(self, x, soft_target, weight=None, avg_factor=None,
                 reduction_override=None):
        assert reduction_override in (None, "none", "mean", "sum")
        reduction = reduction_override if reduction_override else self.reduction
        return im_loss_pallas(x, soft_target,
                              loss_weight=self.loss_weight,
                              reduction=reduction,
                              weight=weight,
                              avg_factor=avg_factor)


if __name__ == "__main__":
    key = jax.random.PRNGKey(0)
    k1, k2, k3, k4 = jax.random.split(key, 4)

    # 1) Small NCHW feature maps forced through the kernel (single tile path).
    x = jax.random.normal(k1, (2, 4, 16, 16), dtype=jnp.float32)
    soft_target = jax.random.normal(k2, (2, 4, 16, 16), dtype=jnp.float32)
    loss = im_loss_pallas(x, soft_target, loss_weight=1.0, min_kernel_elems=0)
    loss = jax.block_until_ready(loss)
    ref = jnp.mean((x - soft_target) ** 2)
    assert jnp.allclose(loss, ref, rtol=1e-5, atol=1e-6), (loss, ref)

    # 2) Non-multiple-of-1024 element count + tiny forced tile: exercises the
    #    pad-to-group path, multi-tile accumulation, odd tile count across the
    #    two core splits, and the masked tail/duplicate tiles.
    x2 = jax.random.normal(k3, (2, 3, 20, 20), dtype=jnp.float32)
    t2 = jax.random.normal(k4, (2, 3, 20, 20), dtype=jnp.float32)
    loss2 = im_loss_pallas(x2, t2, loss_weight=0.5,
                           min_kernel_elems=0, max_block_groups=1)
    loss2 = jax.block_until_ready(loss2)
    ref2 = 0.5 * jnp.mean((x2 - t2) ** 2)
    assert jnp.allclose(loss2, ref2, rtol=1e-5, atol=1e-6), (loss2, ref2)

    # 3) bf16 inputs stay bf16 on the wire; the kernel upcasts per tile.
    xb = x.astype(jnp.bfloat16)
    tb = soft_target.astype(jnp.bfloat16)
    loss3 = im_loss_pallas(xb, tb, loss_weight=1.0, min_kernel_elems=0)
    loss3 = jax.block_until_ready(loss3)
    ref3 = jnp.mean((xb.astype(jnp.float32) - tb.astype(jnp.float32)) ** 2)
    assert jnp.allclose(loss3, ref3, rtol=1e-5, atol=1e-6), (loss3, ref3)

    # 4) Default module path: small inputs short-circuit to a fused reduction.
    loss_mod = IMLossPallas(reduction="mean", loss_weight=1.0)
    loss4 = jax.block_until_ready(loss_mod(x, soft_target))
    assert jnp.allclose(loss4, ref, rtol=1e-5, atol=1e-6), (loss4, ref)

    print("KERNEL_OK")
</pallas_src>

<mosaic_0001>
module attributes {stable_mosaic.version = 11 : i64} {
  func.func @_mse_partial_kernel(%arg0: i32, %arg1: i32, %arg2: memref<2x8x128xf32, #tpu.memory_space<vmem>>, %arg3: memref<2x8x128xf32, #tpu.memory_space<vmem>>, %arg4: memref<8x128xf32, #tpu.memory_space<vmem>>, %arg5: memref<8x128xf32, #tpu.memory_space<vmem>>) attributes {dimension_semantics = [#tpu.dimension_semantics<parallel>, #tpu.dimension_semantics<arbitrary>], iteration_bounds = array<i64: 2, 1>, scalar_prefetch = 0 : i64, scratch_operands = 1 : i64, tpu.core_type = #tpu.core_type<tc>, window_params = [{transform_indices = @transform_0, window_bounds = array<i64: 2, 8, 128>}, {transform_indices = @transform_1, window_bounds = array<i64: 2, 8, 128>}, {transform_indices = @transform_2, window_bounds = array<i64: 8, 128>}]} {
    %c0_i32 = arith.constant 0 : i32
    %0 = arith.cmpi eq, %arg1, %c0_i32 : i32
    %1 = arith.extui %0 : i1 to i32
    %c0_i32_0 = arith.constant 0 : i32
    %2 = arith.cmpi ne, %1, %c0_i32_0 : i32
    scf.if %2 {
      %cst_14 = arith.constant 0.000000e+00 : f32
      %23 = vector.broadcast %cst_14 : f32 to vector<8x128xf32>
      %c0_15 = arith.constant 0 : index
      %c0_16 = arith.constant 0 : index
      %24 = vector.load %arg5[%c0_15, %c0_16] : memref<8x128xf32, #tpu.memory_space<vmem>>, vector<8x128xf32>
      tpu.vector_store %arg5[%c0_15, %c0_16], %23 {strides = array<i32>} : memref<8x128xf32, #tpu.memory_space<vmem>>, vector<8x128xf32>,
    } else {
    }
    %c1_i32 = arith.constant 1 : i32
    %3 = arith.muli %arg0, %c1_i32 : i32
    %4 = arith.addi %3, %arg1 : i32
    %c2_i32 = arith.constant 2 : i32
    %5 = arith.muli %4, %c2_i32 : i32
    %c2_i32_1 = arith.constant 2 : i32
    %6 = arith.subi %c2_i32_1, %5 : i32
    %7 = tpu.iota {dimensions = array<i32: 0>} : vector<2x8x128xi32>
    %c0 = arith.constant 0 : index
    %c0_2 = arith.constant 0 : index
    %c0_3 = arith.constant 0 : index
    %8 = vector.load %arg2[%c0, %c0_2, %c0_3] : memref<2x8x128xf32, #tpu.memory_space<vmem>>, vector<2x8x128xf32>
    %c0_4 = arith.constant 0 : index
    %c0_5 = arith.constant 0 : index
    %c0_6 = arith.constant 0 : index
    %9 = vector.load %arg3[%c0_4, %c0_5, %c0_6] : memref<2x8x128xf32, #tpu.memory_space<vmem>>, vector<2x8x128xf32>
    %10 = arith.subf %8, %9 : vector<2x8x128xf32>
    %11 = vector.broadcast %6 : i32 to vector<2x8x128xi32>
    %12 = arith.cmpi slt, %7, %11 : vector<2x8x128xi32>
    %13 = arith.mulf %10, %10 : vector<2x8x128xf32>
    %cst = arith.constant 0.000000e+00 : f32
    %14 = vector.broadcast %cst : f32 to vector<2x8x128xf32>
    %15 = arith.select %12, %13, %14 : vector<2x8x128xi1>, vector<2x8x128xf32>
    %c0_7 = arith.constant 0 : index
    %c0_8 = arith.constant 0 : index
    %16 = vector.load %arg5[%c0_7, %c0_8] : memref<8x128xf32, #tpu.memory_space<vmem>>, vector<8x128xf32>
    %cst_9 = arith.constant dense<0.000000e+00> : vector<8x128xf32>
    %17 = vector.multi_reduction <add>, %15, %cst_9 [0] : vector<2x8x128xf32> to vector<8x128xf32>
    %18 = arith.addf %16, %17 : vector<8x128xf32>
    %c0_10 = arith.constant 0 : index
    %c0_11 = arith.constant 0 : index
    %19 = vector.load %arg5[%c0_10, %c0_11] : memref<8x128xf32, #tpu.memory_space<vmem>>, vector<8x128xf32>
    tpu.vector_store %arg5[%c0_10, %c0_11], %18 {strides = array<i32>} : memref<8x128xf32, #tpu.memory_space<vmem>>, vector<8x128xf32>,
    %c0_i32_12 = arith.constant 0 : i32
    %20 = arith.cmpi eq, %arg1, %c0_i32_12 : i32
    %21 = arith.extui %20 : i1 to i32
    %c0_i32_13 = arith.constant 0 : i32
    %22 = arith.cmpi ne, %21, %c0_i32_13 : i32
    scf.if %22 {
      %c0_14 = arith.constant 0 : index
      %c0_15 = arith.constant 0 : index
      %23 = vector.load %arg5[%c0_14, %c0_15] : memref<8x128xf32, #tpu.memory_space<vmem>>, vector<8x128xf32>
      %c0_16 = arith.constant 0 : index
      %c0_17 = arith.constant 0 : index
      %24 = vector.load %arg4[%c0_16, %c0_17] : memref<8x128xf32, #tpu.memory_space<vmem>>, vector<8x128xf32>
      tpu.vector_store %arg4[%c0_16, %c0_17], %23 {strides = array<i32>} : memref<8x128xf32, #tpu.memory_space<vmem>>, vector<8x128xf32>,
    } else {
    }
    return
  }
  func.func @transform_0(%arg0: i32, %arg1: i32) -> (i32, i32, i32) {
    %c1_i32 = arith.constant 1 : i32
    %0 = arith.muli %arg0, %c1_i32 : i32
    %1 = arith.addi %0, %arg1 : i32
    %c0_i32 = arith.constant 0 : i32
    %2 = arith.minsi %1, %c0_i32 : i32
    %c0_i32_0 = arith.constant 0 : i32
    %c0_i32_1 = arith.constant 0 : i32
    %c0_i32_2 = arith.constant 0 : i32
    return %2, %c0_i32_0, %c0_i32_1 : i32, i32, i32
  }
  func.func @transform_1(%arg0: i32, %arg1: i32) -> (i32, i32, i32) {
    %c1_i32 = arith.constant 1 : i32
    %0 = arith.muli %arg0, %c1_i32 : i32
    %1 = arith.addi %0, %arg1 : i32
    %c0_i32 = arith.constant 0 : i32
    %2 = arith.minsi %1, %c0_i32 : i32
    %c0_i32_0 = arith.constant 0 : i32
    %c0_i32_1 = arith.constant 0 : i32
    %c0_i32_2 = arith.constant 0 : i32
    return %2, %c0_i32_0, %c0_i32_1 : i32, i32, i32
  }
  func.func @transform_2(%arg0: i32, %arg1: i32) -> (i32, i32) {
    %c0_i32 = arith.constant 0 : i32
    %c0_i32_0 = arith.constant 0 : i32
    return %arg0, %c0_i32 : i32, i32
  }
}

</mosaic_0001>

<bundles_post_ra>
// kernel: tpu_custom_call.1
= control target key start
LH: loop header
LB: loop body
LE: loop exit
PB: predicated region body
PF: predicated region fallthrough
CT: control target
= control target key end

     0   :  { %7 = vsyncpa [#allocation4], 0  ;;  %s892_s0 = inlined_call_operand.hbm [shape: f32[2,8,128], index: 0, kind: input, shape index: {}]   ;;  %s893_s1 = inlined_call_operand.hbm [shape: f32[2,8,128], index: 1, kind: input, shape index: {}]   ;;  %s894_s2 = inlined_call_operand.hbm [shape: f32[16,128], index: 2, kind: output, shape index: {}]  }
   0x1   :  { %9 = vsyncpa [#allocation4 + $0x1], 0 }
   0x2   :  { %10 = vsyncpa [#allocation7], 0 }
   0x3   :  { %12 = vsyncpa [#allocation7 + $0x1], 0 }
   0x4   :  { %13 = vsyncpa [#allocation5], 0 }
   0x5   :  { %15 = vsyncpa [#allocation5 + $0x1], 0  ;;  %s688_s9 = smov 0   ;;  %s690_s10 = smov 0  }
   0x6   :  { %s692_s11 = smov 0   ;;  %s694_s12 = smov 0  }
   0x7   :  { %s696_s13 = smov 0   ;;  %s698_s14 = smov 0  }
   0x8   :  { %s700_s15 = smov 0   ;;  %s702_s16 = smov 0  }
   0x9 LB: > { %s385_s17 = sadd.s32 4294967295, %s666_s16   ;;  %s386_s18 = sadd.s32 4294967294, %s666_s16   ;;  %s666_s16 = sphi %s702_s16, %s21_s16   ;;  %s662_s15 = sphi %s700_s15, %s913_s15   ;;  %s658_s14 = sphi %s698_s14, %s912_s14   ;;  %s654_s13 = sphi %s696_s13, %s882_s13   ;;  %s650_s12 = sphi %s694_s12, %s911_s12   ;;  %s646_s11 = sphi %s692_s11, %s910_s11   ;;  %s642_s10 = sphi %s690_s10, %s909_s10   ;;  %s638_s9 = sphi %s688_s9, %s908_s9  }
   0xa   : > { %s33_s19 = sadd.s32 1, %s662_s15  ;;  %p635_p1 = scmp.ne.s32.totalorder %s654_s13, 0 }
   0xb   : > { %p35_p0 = scmp.ge.s32.totalorder %s33_s19, 2  ;;  %p54_p2 = scmp.eq.s32.totalorder %s666_s16, 0 }
   0xc   : > { %p59_p3 = scmp.ne.s32.totalorder %s654_s13, %s650_s12  ;;  %p60_p5 = scmp.eq.s32.totalorder %s385_s17, 0 }
   0xd   : > { %s915_s19 = smov (%p35_p0, %s33_s19), 0  ;;  %p734_p4 = por %p635_p1, %p54_p2 }
   0xe   : > { %p738_p6 = por %p60_p5, %p59_p3  ;;  %s101_s22 = ssub.s32 %s662_s15, %s915_s19 }
   0xf   : > { %p102_p7 = scmp.eq.s32.totalorder %s101_s22, 0  ;;  %s104_s23 = sadd.s32 1, %s646_s11 }
  0x10   : > { %s898_s21 = scalar_select %p738_p6, 1, 0 }
  0x11   : > { %s746_s24 = scalar_select %p102_p7, %s646_s11, %s104_s23  }
  0x12   : > { %p114_p8 = scmp.ne.s32.totalorder %s646_s11, %s642_s10  ;;  %p115_p9 = scmp.eq.s32.totalorder %s385_s17, 1 }
  0x13   : > { %p120_p10 = scmp.ne.s32.totalorder %s642_s10, %s638_s9  ;;  %p121_p11 = scmp.eq.s32.totalorder %s386_s18, 1 }
  0x14   : > { %p752_p12 = por %p115_p9, %p114_p8  ;;  %p423_p1 = scmp.lt.s32.totalorder %s666_s16, 2 }
  0x15   : > { %p757_p0 = por %p121_p11, %p120_p10  ;;  %s668_s27 = smov [#allocation3]  }
  0x16   : > { %s899_s25 = scalar_select %p752_p12, 1, 0 }
  0x17   : > { %s900_s26 = scalar_select %p757_p0, 1, 0 }
  0x18   : > { %s155_s28 = sshll.u32 %s668_s27, 4  ;;  %p764_p2 = pnand %p423_p1, %p734_p4  ;;  %s156_s28 = int_to_ptr.vmem [resolvable:$true] %s155_s28 }
  0x19   : > { %s499_s4 = scalar_lea.hbm %s892_s0, 256 }
  0x1a   : > { %p500_p3 = scmp.ne.s32.totalorder %s892_s0, %s499_s4  ;;  %p501_p5 = pneg %p764_p2 }
  0x1b   : > { %p506_p8 = scmp.lt.u32.totalorder %s499_s4, %s499_s4  ;;  %p508_p9 = scmp.lt.u32.totalorder %s499_s4, %s892_s0 }
  0x1c   : > { %p502_p7 = pnand %p501_p5, %p500_p3 }
  0x1d   : > { %p509_p10 = por %p508_p9, %p506_p8 }
  0x1e   : > { %p503_p4 = pneg %p502_p7 }
  0x20   : > { %p510_p11 = pnand %p509_p10, %p503_p4 }
  0x22   : > { %513 = shalt.err (!%p510_p11)
}
  0x23   : > { %s514_s12 = scalar_lea.vmem %s156_s28, 256  ;;  %s521_s17 = scalar_lea.vmem %s156_s28, 512 }
  0x24   : > { %p515_p1 = scmp.ne.s32.totalorder %s156_s28, %s514_s12  ;;  %p522_p12 = scmp.lt.s32.totalorder %s156_s28, %s156_s28 }
  0x25   : > { %p523_p6 = scmp.lt.s32.totalorder %s521_s17, %s514_s12 }
  0x26   : > { %p517_p13 = pnand %p515_p1, %p501_p5 }
  0x27   : > { %p524_p3 = por %p523_p6, %p522_p12 }
  0x28   : > { %p518_p0 = pneg %p517_p13 }
  0x2a   : > { %p525_p7 = pnand %p524_p3, %p518_p0 }
  0x2c   : > { %528 = shalt.err (!%p525_p7)
}
  0x2d   : > { %s669_s18 = smov 128   ;;  %s670_s20 = smov 8  }
  0x2e   : > { %415 = dma.hbm_to_vmem [thread:$0]  (!%p764_p2), %s892_s0, 256, %s156_s28, [#allocation4], %s669_s18, %s669_s18, %s670_s20  }
  0x2f   : > { %p395_p13 = scmp.ge.s32.totalorder %s666_s16, 1  ;;  %p187_p4 = scmp.lt.s32.totalorder %s666_s16, 3 }
  0x30   : > { %s671_s30 = smov [#allocation6]   ;;  %s529_s6 = scalar_lea.hbm %s893_s1, 256 }
  0x31   : > { %p795_p8 = pnand %p395_p13, %p187_p4  ;;  %s179_s3 = sshll.u32 %s671_s30, 4  ;;  %s180_s3 = int_to_ptr.vmem [resolvable:$true] %s179_s3 }
  0x32   : > { %p530_p6 = scmp.ne.s32.totalorder %s893_s1, %s529_s6  ;;  %p536_p9 = scmp.lt.u32.totalorder %s529_s6, %s529_s6 }
  0x33   : > { %s902_s27 = scalar_select %p795_p8, 1, 0 }
  0x34   : > { %p532_p12 = pnand %p530_p6, %p501_p5  ;;  %p538_p10 = scmp.lt.u32.totalorder %s529_s6, %s893_s1 }
  0x36   : > { %p533_p0 = pneg %p532_p12  ;;  %p539_p11 = por %p538_p10, %p536_p9 }
  0x38   : > { %p540_p1 = pnand %p539_p11, %p533_p0 }
  0x3a   : > { %543 = shalt.err (!%p540_p1)
}
  0x3b   : > { %s544_s17 = scalar_lea.vmem %s180_s3, 256  ;;  %s551_s22 = scalar_lea.vmem %s180_s3, 512 }
  0x3c   : > { %p545_p3 = scmp.ne.s32.totalorder %s180_s3, %s544_s17  ;;  %p552_p4 = scmp.lt.s32.totalorder %s180_s3, %s180_s3 }
  0x3d   : > { %p553_p8 = scmp.lt.s32.totalorder %s551_s22, %s544_s17 }
  0x3e   : > { %p547_p7 = pnand %p545_p3, %p501_p5 }
  0x3f   : > { %p554_p6 = por %p553_p8, %p552_p4 }
  0x40   : > { %p548_p13 = pneg %p547_p7 }
  0x42   : > { %p555_p12 = pnand %p554_p6, %p548_p13 }
  0x44   : > { %558 = shalt.err (!%p555_p12)
}
  0x45   : > { %418 = dma.hbm_to_vmem [thread:$0]  (!%p764_p2), %s893_s1, 256, %s180_s3, [#allocation7], %s669_s18, %s669_s18, %s670_s20  }
  0x46   : > { %p903_p0 = scmp.ne.s32.totalorder %s902_s27, 0 }
  0x47   : > { %s193_s4 = sand.u32 (!%p903_p0), 1, %s654_s13   ;;  %p904_p5 = scmp.ne.s32.totalorder (!%p903_p0), %s898_s21, 0 }
  0x48   : > { %191 = sbr.rel (%p903_p0) target bundleno = 110 (0x6e), region = 28  ;;  %s396_s5 = sshll.u32 (!%p903_p0), %s193_s4, 4 }
  0x49   : > { %s194_s6 = scalar_lea.sflag (!%p903_p0), [#allocation4], %s193_s4  ;;  %s197_s7 = scalar_lea.vmem (!%p903_p0), [#allocation3], %s396_s5 }
  0x4f   : > { %624 = dma.done.wait (%p904_p5), %s194_s6, 256  }
  0x50   : > { %626 = vsyncadd (%p904_p5), %s194_s6, 4294967040  ;;  %s203_s29 = scalar_lea.sflag [#allocation7], %s193_s4  ;;  %s206_s8 = scalar_lea.vmem [#allocation6], %s396_s5 }
  0x51   : > { %628 = dma.done.wait (%p904_p5), %s203_s29, 256  }
  0x52   : > { %630 = vsyncadd (%p904_p5), %s203_s29, 4294967040  ;;  %s399_s18 = sshll.u32 %s658_s14, 1  ;;  %s229_s20 = sand.u32 1, %s642_s10   ;;  %v248_v1 = vld [vmem:[%s197_s7] sm:$0xff]  ;;  %v249_v2 = vld [vmem:[%s197_s7 + $0x8] sm:$0xff] }
  0x53   : > { %s247_s27 = ssub.s32 2, %s399_s18  ;;  %s398_s3 = sshll.u32 %s229_s20, 3  ;;  %v250_v3 = vld [vmem:[%s206_s8] sm:$0xff]  ;;  %v251_v4 = vld [vmem:[%s206_s8 + $0x8] sm:$0xff] }
  0x54   : > { %v254_v0 = vstv %s247_s27  ;;  %v252_v5 = vsub.f32 %v248_v1, %v250_v3  ;;  %v253_v6 = vsub.f32 %v249_v2, %v251_v4  ;;  %s231_s21 = scalar_lea.vmem [#allocation8], %s398_s3  ;;  %s401_s12 = sshll.u32 %s658_s14, 7 }
  0x55   : > { %vm255_vm0 = vcmp.gt.s32.totalorder %v254_v0, 0  ;;  %vm256_vm1 = vcmp.gt.s32.totalorder %v254_v0, 1  ;;  %s284_s28 = sshll.u32 %s231_s21, 4  ;;  %s841_s23 = scalar_lea.hbm %s894_s2, %s401_s12  ;;  %s836_s28 = int_to_ptr.vmem [resolvable:$true] %s284_s28 }
  0x56   : > { %v257_v7 = vmul.f32 %v252_v5, %v252_v5  ;;  %v258_v8 = vmul.f32 %v253_v6, %v253_v6  ;;  %s271_s30 = scalar_lea.sflag [#allocation5], %s229_s20  ;;  %s559_s4 = scalar_lea.vmem %s836_s28, 128 }
  0x57   : > { %p560_p2 = scmp.ne.s32.totalorder %s836_s28, %s559_s4  ;;  %p905_p8 = scmp.ne.s32.totalorder %s899_s25, 0 }
  0x58   : > { %v259_v9 = vsel %vm255_vm0, %v257_v7, 0.0  ;;  %v260_v10 = vsel %vm256_vm1, %v258_v8, 0.0  ;;  %s672_s14 = smov [#allocation8]  }
  0x59   : > { %v262_v11 = vadd.f32 %v260_v10, %v259_v9  ;;  %p561_p9 = pnand %p560_p2, %p905_p8  ;;  %s563_s5 = sshll.u32 %s672_s14, 4  ;;  %s564_s5 = int_to_ptr.vmem [resolvable:$false] %s563_s5 }
  0x5a   : > { %s565_s6 = scalar_lea.vmem %s564_s5, 256  ;;  %p566_p11 = scmp.lt.s32.totalorder %s836_s28, %s564_s5 }
  0x5b   : > { %269 = vst [vmem:[%s231_s21] sm:$0xff] %v262_v11  ;;  %p562_p10 = pneg %p561_p9  ;;  %p567_p1 = scmp.lt.s32.totalorder %s565_s6, %s559_s4 }
  0x5d   : > { %p568_p3 = por %p567_p1, %p566_p11 }
  0x5f   : > { %p569_p7 = pnand %p568_p3, %p562_p10 }
  0x61   : > { %572 = shalt.err (!%p569_p7)
}
  0x62   : > { %s573_s7 = scalar_lea.hbm %s841_s23, 128  ;;  %s577_s18 = scalar_lea.hbm %s894_s2, 256 }
  0x63   : > { %p574_p13 = scmp.ne.s32.totalorder %s841_s23, %s573_s7  ;;  %p578_p12 = scmp.lt.u32.totalorder %s841_s23, %s894_s2 }
  0x64   : > { %p579_p0 = scmp.lt.u32.totalorder %s577_s18, %s573_s7  ;;  %p581_p2 = scmp.lt.u32.totalorder %s573_s7, %s841_s23 }
  0x65   : > { %p575_p4 = pnand %p574_p13, %p905_p8 }
  0x66   : > { %p580_p5 = por %p579_p0, %p578_p12 }
  0x67   : > { %p576_p6 = pneg %p575_p4 }
  0x68   : > { %p582_p9 = por %p581_p2, %p580_p5 }
  0x6a   : > { %p583_p10 = pnand %p582_p9, %p576_p6 }
  0x6c   : > { %586 = shalt.err (!%p583_p10)
}
  0x6d   : > { %410 = dma.vmem_to_hbm [thread:$0]  (%p905_p8), %s836_s28, 128, %s841_s23, %s271_s30  }
  0x6e PF: > { %s296_s3 = sand.u32 1, %s638_s9   ;;  %p906_p11 = scmp.ne.s32.totalorder %s900_s26, 0 }
  0x6f   : > { %p907_p1 = scmp.ge.s32.totalorder %s666_s16, 2  ;;  %s297_s21 = scalar_lea.sflag [#allocation5], %s296_s3 }
  0x71   : > { %p420_p3 = pnand %p907_p1, %p906_p11 }
  0x73   : > { %632 = dma.done.wait (!%p420_p3), %s297_s21, 128  }
  0x74   : > { %634 = vsyncadd (!%p420_p3), %s297_s21, 4294967168  ;;  %s21_s16 = sadd.s32 1, %s666_s16   ;;  %s908_s9 = smov %s642_s10 }
  0x75   : > { %p18_p7 = scmp.ge.s32.totalorder %s21_s16, 4   ;;  %s909_s10 = smov %s646_s11 }
  0x76   : > { %s910_s11 = smov %s746_s24  ;;  %s911_s12 = smov %s654_s13 }
  0x77   : > { %s882_s13 = smov 0   ;;  %s912_s14 = smov %s662_s15 }
  0x78   : > { %s913_s15 = smov %s915_s19  ;;  %20 = sbr.rel (!%p18_p7) target bundleno = 9 (0x9), region = 94 }
  0x7f   :  { %302 = vsyncpa [#allocation4], 1 }
  0x80   :  { %304 = vsyncpa [#allocation4 + $0x1], 1 }
  0x81   :  { %305 = vsyncpa [#allocation7], 1 }
  0x82   :  { %307 = vsyncpa [#allocation7 + $0x1], 1 }
  0x83   :  { %308 = vsyncpa [#allocation5], 1 }
  0x84   :  { %310 = vsyncpa [#allocation5 + $0x1], 1 }

</bundles_post_ra>
